<compile_context>
chip_gen: v7x
topology: tpu7x:2x2x1
jax: 0.10.0
libtpu: 0.0.40
codegen_flags: <defaults>
</compile_context>

<pallas_src>
import functools
import math

import jax
import jax.numpy as jnp
from jax.experimental import pallas as pl
from jax.experimental.pallas import tpu as pltpu

_LANE = 128                   # lane quantum (last dim)
_TARGET_CHUNKS = 16           # keep both v7x TensorCores' DMA queues busy
_MIN_CHUNK_BYTES = 256 * 1024 # amortize per-grid-step overhead


def _dma_flatten_kernel(x_ref, o_ref, sem, *, rows_per_chunk):
    """One grid step: copy a contiguous row-slab HBM -> HBM via DMA."""
    i = pl.program_id(0)
    start = pl.multiple_of(i * rows_per_chunk, rows_per_chunk)
    cp = pltpu.make_async_copy(
        x_ref.at[pl.ds(start, rows_per_chunk)],
        o_ref.at[pl.ds(start, rows_per_chunk)],
        sem,
    )
    cp.start()
    cp.wait()


def _flat_view_params(total):
    """(rows, width) for a lane-dense flat view, or None if 128-unaligned."""
    if total % _LANE:
        return None
    for w in (512, 256, 128):          # 512-wide already sits on the BW plateau
        if total % w == 0:
            return total // w, w
    return None                        # unreachable: total % 128 == 0


def _pick_num_chunks(rows, width, itemsize):
    """Most chunks (<=16) that evenly divide rows with >=256 KiB per chunk."""
    best = 1
    for n in range(2, min(rows, _TARGET_CHUNKS) + 1):
        if rows % n == 0 and (rows // n) * width * itemsize >= _MIN_CHUNK_BYTES:
            best = n
    return best


def _flatten_copy(x2d):
    """Materialize a copy of the flattened (B, D) array via HBM->HBM DMA."""
    B, D = x2d.shape
    itemsize = jnp.dtype(x2d.dtype).itemsize
    total = B * D

    flat = _flat_view_params(total)
    if flat is None:
        # Lane-unaligned total: one whole-array DMA over the (B, D) view.
        # (Arbitrary shapes are legal for DMA; no VMEM tiles are involved.)
        rows, width = B, D
        view = x2d
        n_chunks = 1
    else:
        rows, width = flat
        # Order-preserving flat view; a free bitcast in the large/aligned
        # regime where the kernel path would ever matter.
        view = x2d.reshape(rows, width)
        n_chunks = _pick_num_chunks(rows, width, itemsize)
    rows_per_chunk = rows // n_chunks

    out = pl.pallas_call(
        functools.partial(_dma_flatten_kernel, rows_per_chunk=rows_per_chunk),
        out_shape=jax.ShapeDtypeStruct((rows, width), x2d.dtype),
        grid=(n_chunks,),
        in_specs=[pl.BlockSpec(memory_space=pl.ANY)],
        out_specs=pl.BlockSpec(memory_space=pl.ANY),
        scratch_shapes=[pltpu.SemaphoreType.DMA(())],
        compiler_params=pltpu.CompilerParams(
            dimension_semantics=("parallel",)),
    )(view)
    return out.reshape(B, D)


def flatten_layer(x, *, use_kernel=False):
    """Pallas equivalent of FlattenLayer.forward: (B, ...) -> (B, prod(...)).

    Default (recommended) path emits NO kernel: the flatten is just a
    row-major reshape, matching torch x.view(x.shape[0], -1).  Set
    use_kernel=True only when an explicit copy kernel is needed as a
    fusion / donation anchor; it runs at pure DMA/HBM bandwidth.
    """
    B = x.shape[0]
    D = math.prod(x.shape[1:])
    x2d = x.reshape(B, D)
    if not use_kernel:
        return x2d
    return _flatten_copy(x2d)


if __name__ == "__main__":
    key = jax.random.PRNGKey(0)

    # Small NCHW input: batch=2, channels=4, spatial=16x16  ->  D = 1024.
    x = jax.random.normal(key, (2, 4, 16, 16), dtype=jnp.float32)
    ref = x.reshape(2, -1)  # torch x.view(x.shape[0], -1) semantics

    # Recommended production path: metadata-only reshape, no kernel.
    y0 = flatten_layer(x)
    jax.block_until_ready(y0)
    assert y0.shape == (2, 4 * 16 * 16), y0.shape
    assert jnp.array_equal(y0, ref), "flatten mismatch (no-kernel path)"

    # Kernel path (fusion anchor): single-chunk HBM->HBM DMA, grid=(1,).
    y1 = flatten_layer(x, use_kernel=True)
    jax.block_until_ready(y1)
    assert y1.shape == ref.shape and y1.dtype == ref.dtype
    assert jnp.array_equal(y1, ref), "flatten mismatch (DMA kernel)"

    # Larger aligned case exercising the chunked multi-step DMA path.
    x2 = jax.random.normal(jax.random.PRNGKey(0), (16, 8, 32, 32),
                           dtype=jnp.float32)
    y2 = flatten_layer(x2, use_kernel=True)
    jax.block_until_ready(y2)
    assert jnp.array_equal(y2, x2.reshape(16, -1)), "flatten mismatch (chunked)"

    # Lane-unaligned total (D = 105): whole-array single-DMA fallback.
    x3 = jax.random.normal(jax.random.PRNGKey(0), (2, 3, 5, 7),
                           dtype=jnp.float32)
    y3 = flatten_layer(x3, use_kernel=True)
    jax.block_until_ready(y3)
    assert jnp.array_equal(y3, x3.reshape(2, -1)), "flatten mismatch (unaligned)"

    print("KERNEL_OK")
</pallas_src>

<mosaic_0001>
module attributes {stable_mosaic.version = 11 : i64} {
  func.func @_dma_flatten_kernel(%arg0: i32, %arg1: memref<4x512xf32, #tpu.memory_space<any>>, %arg2: memref<4x512xf32, #tpu.memory_space<any>>, %arg3: memref<!tpu.dma_semaphore, #tpu.memory_space<semaphore_mem>>) attributes {dimension_semantics = [#tpu.dimension_semantics<parallel>], iteration_bounds = array<i64: 1>, scalar_prefetch = 0 : i64, scratch_operands = 1 : i64, tpu.core_type = #tpu.core_type<tc>, window_params = [{}, {}]} {
    %c4_i32 = arith.constant 4 : i32
    %0 = arith.muli %arg0, %c4_i32 : i32
    %1 = tpu.assume_multiple %0, 4 : i32
    %c0_i32 = arith.constant 0 : i32
    %2 = tpu.memref_slice %arg1[%1, %c0_i32] : memref<4x512xf32, #tpu.memory_space<any>> -> memref<4x512xf32, #tpu.memory_space<any>>
    %c0_i32_0 = arith.constant 0 : i32
    %3 = tpu.memref_slice %arg2[%1, %c0_i32_0] : memref<4x512xf32, #tpu.memory_space<any>> -> memref<4x512xf32, #tpu.memory_space<any>>
    tpu.enqueue_dma source(%2 : memref<4x512xf32, #tpu.memory_space<any>>) target(%3 : memref<4x512xf32, #tpu.memory_space<any>>) target_semaphore(%arg3 : memref<!tpu.dma_semaphore, #tpu.memory_space<semaphore_mem>>)
    %c0_i32_1 = arith.constant 0 : i32
    %4 = tpu.memref_slice %arg1[%1, %c0_i32_1] : memref<4x512xf32, #tpu.memory_space<any>> -> memref<4x512xf32, #tpu.memory_space<any>>
    %c0_i32_2 = arith.constant 0 : i32
    %5 = tpu.memref_slice %arg2[%1, %c0_i32_2] : memref<4x512xf32, #tpu.memory_space<any>> -> memref<4x512xf32, #tpu.memory_space<any>>
    tpu.wait_dma2 semaphore(%arg3 : memref<!tpu.dma_semaphore, #tpu.memory_space<semaphore_mem>>) src(%4 : memref<4x512xf32, #tpu.memory_space<any>>) dst(%5 : memref<4x512xf32, #tpu.memory_space<any>>)
    return
  }
}

</mosaic_0001>

<bundles_post_ra>
// kernel: tpu_custom_call.1
= control target key start
LH: loop header
LB: loop body
LE: loop exit
PB: predicated region body
PF: predicated region fallthrough
CT: control target
= control target key end

     0   :  { %s47_s6 = smov [#allocation2]   ;;  %s48_s7 = smov [#allocation3]   ;;  %s66_s0 = inlined_call_operand.hbm [shape: f32[4,512], index: 0, kind: input, shape index: {}]   ;;  %s67_s1 = inlined_call_operand.hbm [shape: f32[4,512], index: 1, kind: output, shape index: {}]  }
   0x1   :  { %s49_s8 = smov 0  }
   0x2   :  { %26 = dma.general %s66_s0, 256, %s67_s1, %s47_s6, %s48_s7, [#allocation4], %s49_s8, 0  }
   0x3   :  { %45 = dma.done.wait [#allocation2], 256 }
   0x4   :  { %46 = vsyncadd [#allocation2], 4294967040 }
   0x5   :  { %31 = vsyncmov [#allocation2] }
   0x8   :  { %s32_s13 = vpop.sfrf %31 }
   0x9   :  { %p41_p0 = scmp.ne.s32.totalorder %s32_s13, 0 }
   0xb   :  { %36 = shalt.err (%p41_p0)  }

</bundles_post_ra>
